<compile_context>
chip_gen: v7x
topology: tpu7x:2x2x1
jax: 0.10.0
libtpu: 0.0.40
codegen_flags: <defaults>
</compile_context>

<pallas_src>
import jax
import jax.numpy as jnp
from jax.experimental import pallas as pl
from jax.experimental.pallas import tpu as pltpu


def _make_epcor_kernel(b_blk, posi, batch_total):
    def kernel(semb_ref, temb_ref, tgtc_ref, corr_ref):
        # semb_ref: (b_blk, D, N)        bf16 src embedding (shared across posi pairs)
        # temb_ref: (b_blk*posi, Nt, D)  bf16 tgt embedding (pre-transposed)
        # tgtc_ref: (b_blk*posi, 3, Nt)  f32  tgt points (channels-first)
        # corr_ref: (b_blk*posi, 3, N)   f32  soft-correspondence points (output)
        g = pl.program_id(0)
        n_valid = jnp.minimum(b_blk, batch_total - g * b_blk)   # tail-block guard

        def bb_body(bb, carry):
            # Fold the "2x" of the score formula into the shared LHS once per
            # batch element (exact in bf16) instead of an (Nt,N) VPU mul/pair.
            s2 = semb_ref[bb] * 2.0                              # (D, N) bf16

            def p_body(p, c):
                r = bb * posi + p
                t = temb_ref[r]                                  # (Nt, D) bf16
                # Scores kept in (Nt, N) orientation so the correspondence
                # matmul below is canonical (no e^T materialisation).
                inner2 = jax.lax.dot_general(
                    t, s2, (((1,), (0,)), ((), ())),
                    preferred_element_type=jnp.float32)          # (Nt, N) = 2<t,s>
                tf = t.astype(jnp.float32)
                yy = jnp.sum(tf * tf, axis=1, keepdims=True)     # (Nt, 1) = ||t||^2
                # pairwise_distance = -||s||^2 + 2<s,t> - ||t||^2 ; the -||s||^2
                # term is a per-src-point constant and drops out of the softmax.
                pd = inner2 - yy
                m = jnp.max(pd, axis=0, keepdims=True)           # (1, N)
                e = jnp.exp(pd - m)                              # unnormalised softmax
                denom = jnp.sum(e, axis=0, keepdims=True)        # (1, N) row sums
                tg = tgtc_ref[r]                                 # (3, Nt) f32
                corr3 = jax.lax.dot_general(
                    tg, e, (((1,), (0,)), ((), ())),
                    preferred_element_type=jnp.float32)          # (3, N), canonical
                # exact normalisation (divide on a (3,N)/(1,N) broadcast is cheap)
                corr_ref[r] = (corr3 / denom).astype(corr_ref.dtype)
                return c

            jax.lax.fori_loop(0, posi, p_body, 0)
            return carry

        jax.lax.fori_loop(0, n_valid, bb_body, 0)

    return kernel


def _pick_block_and_vmem(batch, posi, D, N, Nt):
    """Chip-aware block sizing.  Returns (b_blk, vmem_limit_bytes)."""
    try:
        cap = int(pltpu.get_tpu_info().vmem_capacity_bytes)
    except Exception:
        cap = 64 << 20                      # conservative fallback (v7x-sized)
    if cap >= (100 << 20):                  # v5e / v6e: 128 MiB physical VMEM
        vmem_limit = 96 << 20
    else:                                   # v7x: 64 MiB per TensorCore
        vmem_limit = 32 << 20

    # Bytes DMA'd per batch element (double-buffered by the pipeline).
    per_elem_io = (2 * D * N                # src embedding, bf16
                   + 2 * posi * Nt * D      # tgt embeddings, bf16
                   + 4 * posi * 3 * Nt      # tgt points, f32
                   + 4 * posi * 3 * N)      # src_corr output, f32
    # Live per-pair (Nt, N) f32 intermediates (inner/pd/e + compiler temp);
    # fori_loop bounds this to one pair regardless of b_blk.
    scratch_est = 4 * 4 * Nt * N
    avail = max(vmem_limit - scratch_est - (4 << 20), 2 * per_elem_io)
    b_cap_vmem = max(1, avail // (2 * per_elem_io))

    # Keep >= min(4, batch) grid steps so DMA double-buffering and (on v7x)
    # the second TensorCore stay busy; no "must divide batch" requirement.
    target_steps = min(4, batch)
    b_blk = int(max(1, min(b_cap_vmem, pl.cdiv(batch, target_steps), batch)))
    return b_blk, vmem_limit


def epcor_correspondence(src_emb, tgt_emb_nd, tgt_c):
    """src_emb: (batch, D, N) bf16; tgt_emb_nd: (batch, posi, Nt, D) bf16;
    tgt_c: (batch, posi, 3, Nt) f32.

    Returns src_corr: (batch, posi, 3, N) f32 (EPCOR.getCopairALL soft
    correspondences, training path).
    """
    batch, D, N = src_emb.shape
    _, posi, Nt, _ = tgt_emb_nd.shape

    b_blk, vmem_limit = _pick_block_and_vmem(batch, posi, D, N, Nt)
    grid = (pl.cdiv(batch, b_blk),)

    temb_flat = tgt_emb_nd.reshape(batch * posi, Nt, D)
    tgtc_flat = tgt_c.reshape(batch * posi, 3, Nt)

    kernel = _make_epcor_kernel(b_blk, posi, batch)
    out = pl.pallas_call(
        kernel,
        out_shape=jax.ShapeDtypeStruct((batch * posi, 3, N), jnp.float32),
        grid_spec=pltpu.PrefetchScalarGridSpec(
            num_scalar_prefetch=0,
            grid=grid,
            in_specs=[
                pl.BlockSpec((b_blk, D, N), lambda g: (g, 0, 0)),
                pl.BlockSpec((b_blk * posi, Nt, D), lambda g: (g, 0, 0)),
                pl.BlockSpec((b_blk * posi, 3, Nt), lambda g: (g, 0, 0)),
            ],
            out_specs=pl.BlockSpec((b_blk * posi, 3, N), lambda g: (g, 0, 0)),
        ),
        compiler_params=pltpu.CompilerParams(
            dimension_semantics=("parallel",),
            vmem_limit_bytes=vmem_limit,
        ),
    )(src_emb, temb_flat, tgtc_flat)
    return out.reshape(batch, posi, 3, N)


def pose_solver_forward(src, tgt, src_embedding, tgt_embedding, positive_T):
    """Mirrors PoseSolver.forward (training mode, svd=True, origin=False).

    src, tgt:          (batch, posi_num, num_points, 3)
    src_embedding:     (batch, 1,        D, num_points, 1)
    tgt_embedding:     (batch, posi_num, D, num_points, 1)
    positive_T:        (batch, posi_num, 4, 4)
    """
    batch, posi_num, num_points, C = tgt.shape
    N = num_points

    # channels-first points (matches the module's transpose/view)
    src_c = jnp.swapaxes(src, -1, -2).astype(jnp.float32)      # (batch, posi, 3, N)
    tgt_c = jnp.swapaxes(tgt, -1, -2).astype(jnp.float32)      # (batch, posi, 3, N)

    # embeddings: bf16 halves the dominant HBM traffic; tgt pre-transposed to
    # (Nt, D) so the in-kernel score matmul is canonical. src embedding is
    # reused across posi pairs (replaces the module's repeat()).
    src_emb = src_embedding[:, 0, :, :, 0].astype(jnp.bfloat16)            # (batch, D, N)
    tgt_emb_nd = jnp.swapaxes(
        tgt_embedding[..., 0], -1, -2).astype(jnp.bfloat16)                # (batch, posi, N, D)

    # TODO(synk): the Transformer pointer (self.pointer) class is not provided in
    # the reference source; its residual embedding refinement is treated as identity.

    src_corr4 = epcor_correspondence(src_emb, tgt_emb_nd, tgt_c)  # (batch, posi, 3, N)

    B = batch * posi_num
    src_bc = src_c.reshape(B, 3, N)
    src_corr = src_corr4.reshape(B, 3, N)

    # ----- SVD_Weighted (uniform src_weight = 1/N, EPCOR training path) -----
    wn = (1.0 / N) / (1.0 + 1e-5)                                  # normalized weight
    centroid_a = jnp.sum(src_bc * wn, axis=-1, keepdims=True)      # (B, 3, 1)
    centroid_b = jnp.sum(src_corr * wn, axis=-1, keepdims=True)    # (B, 3, 1)
    a_centered = src_bc - centroid_a
    b_centered = src_corr - centroid_b
    cov = jnp.einsum('bin,bjn->bij', a_centered, b_centered * wn)  # (B, 3, 3)

    u, _, vh = jnp.linalg.svd(cov)
    v = jnp.swapaxes(vh, -1, -2)
    ut = jnp.swapaxes(u, -1, -2)
    rot_pos = v @ ut
    v_neg = v.at[:, :, 2].multiply(-1.0)
    rot_neg = v_neg @ ut
    det = jnp.linalg.det(rot_pos)
    rotation_ab_pred = jnp.where(det[:, None, None] > 0, rot_pos, rot_neg)
    translation_ab_pred = (-rotation_ab_pred @ centroid_a + centroid_b)[..., 0]  # (B,3)

    gt_T = positive_T.reshape(-1, 4, 4)
    rotation_ab = gt_T[:, :3, :3]
    translation_ab = gt_T[:, :3, 3]

    # cor_loss (outlier mask is all-False on the training EPCOR path)
    transformed_src = rotation_ab @ src_bc + translation_ab[:, :, None]
    loss_point = jnp.mean((transformed_src - src_corr) ** 2)

    # pose_loss
    identity = jnp.broadcast_to(jnp.eye(3, dtype=jnp.float32), (B, 3, 3))
    loss_pose = (jnp.mean((jnp.swapaxes(rotation_ab_pred, -1, -2) @ rotation_ab
                           - identity) ** 2)
                 + jnp.mean((translation_ab_pred - translation_ab) ** 2))

    mask_tgt = jnp.zeros((B, N, 1), dtype=bool)

    return {
        'rotation_ab_pred': rotation_ab_pred,
        'translation_ab_pred': translation_ab_pred,
        'rotation_ab': rotation_ab,
        'translation_ab': translation_ab,
        'loss_point': loss_point,
        'loss_pose': loss_pose,
        'mask_tgt': mask_tgt,
    }


if __name__ == "__main__":
    key = jax.random.PRNGKey(0)
    batch, posi_num, num_points, C, D = 2, 2, 128, 3, 32
    k1, k2, k3, k4, k5 = jax.random.split(key, 5)

    src = jax.random.normal(k1, (batch, posi_num, num_points, C), jnp.float32)
    tgt = jax.random.normal(k2, (batch, posi_num, num_points, C), jnp.float32)
    src_embedding = jax.random.normal(k3, (batch, 1, D, num_points, 1), jnp.float32)
    tgt_embedding = jax.random.normal(k4, (batch, posi_num, D, num_points, 1), jnp.float32)

    # ground-truth rigid transforms: identity rotation + small random translation
    t_gt = 0.1 * jax.random.normal(k5, (batch * posi_num, 3), jnp.float32)
    T = jnp.tile(jnp.eye(4, dtype=jnp.float32)[None], (batch * posi_num, 1, 1))
    T = T.at[:, :3, 3].set(t_gt)
    positive_T = T.reshape(batch, posi_num, 4, 4)

    out = pose_solver_forward(src, tgt, src_embedding, tgt_embedding, positive_T)
    jax.block_until_ready(out)
    print("KERNEL_OK")
</pallas_src>

<mosaic_0001>
module attributes {stable_mosaic.version = 11 : i64} {
  func.func @kernel(%arg0: i32, %arg1: memref<1x32x128xbf16, #tpu.memory_space<vmem>>, %arg2: memref<2x128x32xbf16, #tpu.memory_space<vmem>>, %arg3: memref<2x3x128xf32, #tpu.memory_space<vmem>>, %arg4: memref<2x3x128xf32, #tpu.memory_space<vmem>>) attributes {dimension_semantics = [#tpu.dimension_semantics<parallel>], iteration_bounds = array<i64: 2>, scalar_prefetch = 0 : i64, scratch_operands = 0 : i64, tpu.core_type = #tpu.core_type<tc>, window_params = [{transform_indices = @transform_0, window_bounds = array<i64: 1, 32, 128>}, {transform_indices = @transform_1, window_bounds = array<i64: 2, 128, 32>}, {transform_indices = @transform_2, window_bounds = array<i64: 2, 3, 128>}, {transform_indices = @transform_3, window_bounds = array<i64: 2, 3, 128>}]} {
    %c1_i32 = arith.constant 1 : i32
    %0 = arith.muli %arg0, %c1_i32 : i32
    %c2_i32 = arith.constant 2 : i32
    %1 = arith.subi %c2_i32, %0 : i32
    %c1_i32_0 = arith.constant 1 : i32
    %2 = arith.minsi %c1_i32_0, %1 : i32
    %c0_i32 = arith.constant 0 : i32
    %c0_i32_1 = arith.constant 0 : i32
    %3 = arith.subi %2, %c0_i32_1 : i32
    %4 = arith.addi %c0_i32_1, %3 : i32
    %c1_i32_2 = arith.constant 1 : i32
    scf.for %arg5 = %c0_i32_1 to %4 step %c1_i32_2  : i32 {
      %5 = arith.index_cast %arg5 : i32 to index
      %c0 = arith.constant 0 : index
      %c0_3 = arith.constant 0 : index
      %6 = vector.load %arg1[%5, %c0, %c0_3] : memref<1x32x128xbf16, #tpu.memory_space<vmem>>, vector<1x32x128xbf16>
      %7 = vector.shape_cast %6 : vector<1x32x128xbf16> to vector<32x128xbf16>
      %cst = arith.constant 2.000000e+00 : bf16
      %8 = vector.broadcast %cst : bf16 to vector<32x128xbf16>
      %9 = arith.mulf %7, %8 : vector<32x128xbf16>
      %c0_i32_4 = arith.constant 0 : i32
      %c0_i32_5 = arith.constant 0 : i32
      %c2_i32_6 = arith.constant 2 : i32
      %10 = arith.addi %c0_i32_5, %c2_i32_6 : i32
      %c1_i32_7 = arith.constant 1 : i32
      scf.for %arg6 = %c0_i32_5 to %10 step %c1_i32_7  : i32 {
        %c2_i32_9 = arith.constant 2 : i32
        %11 = arith.muli %arg5, %c2_i32_9 : i32
        %12 = arith.addi %11, %arg6 : i32
        %13 = arith.index_cast %12 : i32 to index
        %c0_10 = arith.constant 0 : index
        %c0_11 = arith.constant 0 : index
        %14 = vector.load %arg2[%13, %c0_10, %c0_11] : memref<2x128x32xbf16, #tpu.memory_space<vmem>>, vector<1x128x32xbf16>
        %15 = vector.shape_cast %14 : vector<1x128x32xbf16> to vector<128x32xbf16>
        %cst_12 = arith.constant dense<0.000000e+00> : vector<128x128xf32>
        %16 = tpu.matmul %15, %9, %cst_12 {dimension_numbers = #tpu.dot_dimension_numbers<[1], [0], [0], [1], [0, 0, 1, 1], [], []>} : vector<128x32xbf16>, vector<32x128xbf16>, vector<128x128xf32> -> vector<128x128xf32>
        %17 = arith.extf %15 : vector<128x32xbf16> to vector<128x32xf32>
        %18 = arith.mulf %17, %17 : vector<128x32xf32>
        %cst_13 = arith.constant dense<0.000000e+00> : vector<128xf32>
        %19 = vector.multi_reduction <add>, %18, %cst_13 [1] : vector<128x32xf32> to vector<128xf32>
        %20 = vector.shape_cast %19 : vector<128xf32> to vector<128x1xf32>
        %21 = vector.broadcast %20 : vector<128x1xf32> to vector<128x128xf32>
        %22 = arith.subf %16, %21 : vector<128x128xf32>
        %cst_14 = arith.constant dense<0xFF800000> : vector<128xf32>
        %23 = vector.multi_reduction <maximumf>, %22, %cst_14 [0] : vector<128x128xf32> to vector<128xf32>
        %24 = vector.shape_cast %23 : vector<128xf32> to vector<1x128xf32>
        %25 = vector.broadcast %24 : vector<1x128xf32> to vector<128x128xf32>
        %26 = arith.subf %22, %25 : vector<128x128xf32>
        %27 = math.exp %26 : vector<128x128xf32>
        %cst_15 = arith.constant dense<0.000000e+00> : vector<128xf32>
        %28 = vector.multi_reduction <add>, %27, %cst_15 [0] : vector<128x128xf32> to vector<128xf32>
        %29 = vector.shape_cast %28 : vector<128xf32> to vector<1x128xf32>
        %30 = arith.index_cast %12 : i32 to index
        %c0_16 = arith.constant 0 : index
        %c0_17 = arith.constant 0 : index
        %31 = vector.load %arg3[%30, %c0_16, %c0_17] : memref<2x3x128xf32, #tpu.memory_space<vmem>>, vector<1x3x128xf32>
        %32 = vector.shape_cast %31 : vector<1x3x128xf32> to vector<3x128xf32>
        %cst_18 = arith.constant dense<0.000000e+00> : vector<3x128xf32>
        %33 = tpu.matmul %32, %27, %cst_18 {dimension_numbers = #tpu.dot_dimension_numbers<[1], [0], [0], [1], [0, 0, 1, 1], [], []>} : vector<3x128xf32>, vector<128x128xf32>, vector<3x128xf32> -> vector<3x128xf32>
        %34 = vector.broadcast %29 : vector<1x128xf32> to vector<3x128xf32>
        %35 = arith.divf %33, %34 : vector<3x128xf32>
        %36 = arith.index_cast %12 : i32 to index
        %c0_19 = arith.constant 0 : index
        %c0_20 = arith.constant 0 : index
        %37 = vector.load %arg4[%36, %c0_19, %c0_20] : memref<2x3x128xf32, #tpu.memory_space<vmem>>, vector<1x3x128xf32>
        %38 = vector.shape_cast %37 : vector<1x3x128xf32> to vector<3x128xf32>
        %39 = vector.shape_cast %35 : vector<3x128xf32> to vector<1x3x128xf32>
        tpu.vector_store %arg4[%36, %c0_19, %c0_20], %39 {strides = array<i32>} : memref<2x3x128xf32, #tpu.memory_space<vmem>>, vector<1x3x128xf32>,
      }
      %c2_i32_8 = arith.constant 2 : i32
    }
    return
  }
  func.func @transform_0(%arg0: i32) -> (i32, i32, i32) {
    %c0_i32 = arith.constant 0 : i32
    %c0_i32_0 = arith.constant 0 : i32
    %c0_i32_1 = arith.constant 0 : i32
    return %arg0, %c0_i32, %c0_i32_0 : i32, i32, i32
  }
  func.func @transform_1(%arg0: i32) -> (i32, i32, i32) {
    %c0_i32 = arith.constant 0 : i32
    %c0_i32_0 = arith.constant 0 : i32
    %c0_i32_1 = arith.constant 0 : i32
    return %arg0, %c0_i32, %c0_i32_0 : i32, i32, i32
  }
  func.func @transform_2(%arg0: i32) -> (i32, i32, i32) {
    %c0_i32 = arith.constant 0 : i32
    %c0_i32_0 = arith.constant 0 : i32
    %c0_i32_1 = arith.constant 0 : i32
    return %arg0, %c0_i32, %c0_i32_0 : i32, i32, i32
  }
  func.func @transform_3(%arg0: i32) -> (i32, i32, i32) {
    %c0_i32 = arith.constant 0 : i32
    %c0_i32_0 = arith.constant 0 : i32
    %c0_i32_1 = arith.constant 0 : i32
    return %arg0, %c0_i32, %c0_i32_0 : i32, i32, i32
  }
}

</mosaic_0001>

<bundles_post_ra>
// kernel: tpu_custom_call.1
= control target key start
LH: loop header
LB: loop body
LE: loop exit
PB: predicated region body
PF: predicated region fallthrough
CT: control target
= control target key end

     0   :  { %s1087_s12 = smov 0   ;;  %s1238_s0 = inlined_call_operand.vmem [shape: bf16[2,32,128], index: 0, kind: input, shape index: {}]   ;;  %s1239_s1 = inlined_call_operand.vmem [shape: bf16[4,128,32], index: 1, kind: input, shape index: {}]   ;;  %s1240_s2 = inlined_call_operand.vmem [shape: f32[4,3,128], index: 2, kind: input, shape index: {}]   ;;  %s1241_s3 = inlined_call_operand.vmem [shape: f32[4,3,128], index: 3, kind: output, shape index: {}]  }
   0x1 LB: > { %s809_s13 = sadd.s32 4294967295, %s1054_s12   ;;  %p813_p0 = scmp.ge.s32.totalorder %s1054_s12, 1  ;;  %s1054_s12 = sphi %s1087_s12, %s13_s12  }
   0x2   : > { %p160_p1 = scmp.lt.s32.totalorder %s1054_s12, 3 }
   0x4   : > { %p161_p2 = pnand %p813_p0, %p160_p1 }
   0x5   : > { %p195_p3 = scmp.lt.s32.totalorder (!%p161_p2), %s809_s13, 1  ;;  %s816_s14 = sshll.u32 (!%p161_p2), %s809_s13, 1 }
   0x6   : > { %164 = sbr.rel (%p161_p2) target bundleno = 569 (0x239), region = 32  ;;  %p201_p4 = scmp.lt.s32.totalorder (!%p161_p2), %s816_s14, 3 }
   0x7   : > { %s221_s15 = ssub.s32 (!%p161_p2), 2, %s809_s13 }
   0x8   : > { %p222_p5 = scmp.lt.s32.totalorder (!%p161_p2), %s221_s15, 1  ;;  %p852_p6 = scmp.le.s32.totalorder (!%p161_p2), %s221_s15, 0 }
   0xd   : > { %s1243_s13 = smov (!%p195_p3, %s809_s13), 1  ;;  %s1245_s14 = smov (!%p201_p4, %s816_s14), 3 }
   0xe   : > { %s850_s16 = sshll.u32 %s1243_s13, 4  ;;  %s851_s20 = sshll.u32 %s1245_s14, 6 }
   0xf   : > { %s1098_s19 = scalar_lea.vmem %s1238_s0, %s850_s16  ;;  %s1103_s23 = scalar_lea.vmem %s1239_s1, %s851_s20 }
  0x10   : > { %s820_s24 = sshll.u32 %s1245_s14, 2  ;;  %774 = sbr.rel (%p852_p6) target bundleno = 569 (0x239), region = 91 }
  0x11   : > { %s1108_s27 = scalar_lea.vmem %s1240_s2, %s820_s24  ;;  %s1113_s30 = scalar_lea.vmem %s1241_s3, %s820_s24 }
  0x12   : > { %s1115_s4 = scalar_select %p222_p5, %s221_s15, 1 }
  0x13   : > { %s1117_s5 = smov (!%p852_p6), 0  }
  0x17 LB: >> { %s855_s6 = sshll.u32 %s1058_s5, 4  ;;  %s1136_s8 = smov 0   ;;  %s1058_s5 = sphi %s1117_s5, %s227_s5  }
  0x18   : >> { %s232_s7 = scalar_lea.vmem %s1098_s19, %s855_s6 }
  0x19   : >> { %v1124_v0 = vld [vmem:[%s232_s7] sm:$0xf]  ;;  %v1126_v1 = vld [vmem:[%s232_s7 + $0x4] sm:$0xf]  ;;  %v1128_v2 = vld [vmem:[%s232_s7 + $0x8] sm:$0xf] }
  0x1a   : >> { %v1130_v3 = vld [vmem:[%s232_s7 + $0xc] sm:$0xf]  ;;  %v237_v4 = vmul.bf16 1073758208, %v1124_v0  ;;  %v238_v5 = vmul.bf16 1073758208, %v1126_v1  ;;  %v239_v6 = vmul.bf16 1073758208, %v1128_v2 }
  0x1b   : >> { %v240_v7 = vmul.bf16 1073758208, %v1130_v3 }
  0x1c LB: >>> { %v837_v8 = vcombine.low %v237_v4, %v238_v5  ;;  %s826_s9 = sshll.u32 %s1058_s5, 1  ;;  %vm320_vm0 = vcmask 261120   ;;  %vm1065_vm1 = vmmov 0   ;;  %s1062_s8 = sphi %s1136_s8, %s246_s8  }
  0x1d   : >>> { %v838_v9 = vcombine.low %v239_v6, %v240_v7  ;;  %s1151_s10 = sadd.s32 %s1062_s8, %s826_s9  ;;  %s246_s8 = sadd.s32 1, %s1062_s8  }
  0x1e   : >>> { %884 = vmatprep.subr.bf16.mxu0 %v837_v8  ;;  %s856_s11 = sshll.u32 %s1151_s10, 6  ;;  %s847_s14 = sshll.u32 %s1151_s10, 2 }
  0x1f   : >>> { %885 = vmatpush3.bf16.msra.mxu0 %v837_v8  ;;  %s1155_s13 = scalar_lea.vmem %s1103_s23, %s856_s11  ;;  %s629_s15 = scalar_lea.vmem %s1108_s27, %s847_s14 }
  0x20   : >>> { %886 = vmatprep.subr.bf16.mxu0 %v838_v9  ;;  %v252_v10 = vld [vmem:[%s1155_s13] sm:$0xff]   ;;  %v254_v11 = vld [vmem:[%s1155_s13 + $0x8] sm:$0xff]   ;;  %v256_v12 = vld [vmem:[%s1155_s13 + $0x10] sm:$0xff]   ;;  %s703_s16 = scalar_lea.vmem %s1113_s30, %s847_s14  ;;  %p243_p7 = scmp.ge.s32.totalorder %s246_s8, 2  }
  0x21   : >>> { %v442_v13 = vunpack.c.l.bf16 %v252_v10  ;;  %v444_v14 = vunpack.c.l.bf16 %v254_v11  ;;  %888 = vmatprep.mubr.msk.bf16.mxu0 %vm320_vm0, %v252_v10  ;;  %v443_v16 = vunpack.c.h.bf16 %v252_v10  ;;  %v445_v18 = vunpack.c.h.bf16 %v254_v11  ;;  %v258_v23 = vld [vmem:[%s1155_s13 + $0x18] sm:$0xff]   ;;  %v260_v26 = vld [vmem:[%s1155_s13 + $0x20] sm:$0xff]   ;;  %v262_v39 = vld [vmem:[%s1155_s13 + $0x28] sm:$0xff]   ;;  %s227_s5 = sadd.s32 (%p243_p7), 1, %s1058_s5  }
  0x22   : >>> { %v446_v19 = vunpack.c.l.bf16 %v256_v12  ;;  %v447_v20 = vunpack.c.h.bf16 %v256_v12  ;;  %v448_v29 = vunpack.c.l.bf16 %v258_v23  ;;  %v449_v32 = vunpack.c.h.bf16 %v258_v23  ;;  %v264_v40 = vld [vmem:[%s1155_s13 + $0x30] sm:$0xff]   ;;  %v266_v53 = vld [vmem:[%s1155_s13 + $0x38] sm:$0xff]   ;;  %p226_p8 = scmp.ge.s32.totalorder (%p243_p7), %s227_s5, %s1115_s4 }
  0x23   : >>> { %887 = vmatpush3.bf16.msra.mxu0 %v838_v9  ;;  %v458_v15 = vmul.f32 %v442_v13, %v442_v13  ;;  %v460_v17 = vmul.f32 %v444_v14, %v444_v14  ;;  %v459_v22 = vmul.f32 %v443_v16, %v443_v16  ;;  %v461_v25 = vmul.f32 %v445_v18, %v445_v18 }
  0x24   : >>> { %v462_v28 = vmul.f32 %v446_v19, %v446_v19  ;;  %v463_v31 = vmul.f32 %v447_v20, %v447_v20  ;;  %v464_v34 = vmul.f32 %v448_v29, %v448_v29  ;;  %v450_v35 = vunpack.c.l.bf16 %v260_v26 }
  0x25   : >>> { %v474_v21 = vsel %vm320_vm0, %v458_v15, 0.0  ;;  %v480_v24 = vsel %vm320_vm0, %v460_v17, 0.0  ;;  %v477_v27 = vsel %vm320_vm0, %v459_v22, 0.0  ;;  %v483_v30 = vsel %vm320_vm0, %v461_v25, 0.0 }
  0x26   : >>> { %889 = vmatmul.mubr.msk.bf16.vlgmr.msra.gmra.mrb[0].mxu0 %vm320_vm0, %v254_v11  ;;  %475 = vadd.xlane.f32.xlu0 %v474_v21  ;;  %v486_v33 = vsel %vm320_vm0, %v462_v28, 0.0  ;;  %v489_v36 = vsel %vm320_vm0, %v463_v31, 0.0  ;;  %v465_v37 = vmul.f32 %v449_v32, %v449_v32  ;;  %v451_v38 = vunpack.c.h.bf16 %v260_v26 }
  0x27   : >>> { %892 = vmatprep.mubr.msk.bf16.mxu0 %vm320_vm0, %v256_v12  ;;  %481 = vadd.xlane.f32.xlu1 %v480_v24  ;;  %v492_v41 = vsel %vm320_vm0, %v464_v34, 0.0  ;;  %v466_v42 = vmul.f32 %v450_v35, %v450_v35  ;;  %v452_v43 = vunpack.c.l.bf16 %v262_v39  ;;  %v453_v46 = vunpack.c.h.bf16 %v262_v39 }
  0x28   : >>> { %v495_v44 = vsel %vm320_vm0, %v465_v37, 0.0  ;;  %v467_v45 = vmul.f32 %v451_v38, %v451_v38  ;;  %v454_v49 = vunpack.c.l.bf16 %v264_v40  ;;  %v455_v52 = vunpack.c.h.bf16 %v264_v40 }
  0x29   : >>> { %v498_v47 = vsel %vm320_vm0, %v466_v42, 0.0  ;;  %v468_v48 = vmul.f32 %v452_v43, %v452_v43  ;;  %v469_v51 = vmul.f32 %v453_v46, %v453_v46  ;;  %v456_v56 = vunpack.c.l.bf16 %v266_v53 }
  0x2a   : >>> { %478 = vadd.xlane.f32.xlu0 %v477_v27  ;;  %v501_v50 = vsel %vm320_vm0, %v467_v45, 0.0  ;;  %v470_v55 = vmul.f32 %v454_v49, %v454_v49  ;;  %v471_v58 = vmul.f32 %v455_v52, %v455_v52  ;;  %v457_v59 = vunpack.c.h.bf16 %v266_v53 }
  0x2b   : >>> { %484 = vadd.xlane.f32.xlu1 %v483_v30  ;;  %v504_v54 = vsel %vm320_vm0, %v468_v48, 0.0  ;;  %v507_v57 = vsel %vm320_vm0, %v469_v51, 0.0  ;;  %v472_v61 = vmul.f32 %v456_v56, %v456_v56  ;;  %v1064_v10 = vmov 0.0|0.0  }
  0x2c   : >>> { %v510_v60 = vsel %vm320_vm0, %v470_v55, 0.0  ;;  %v513_v62 = vsel %vm320_vm0, %v471_v58, 0.0  ;;  %v473_v63 = vmul.f32 %v457_v59, %v457_v59  ;;  %939 = vmatprep.subr.bf16.mxu1 %v1064_v10  ;;  %v1066_v11 = vmov 0.0  }
  0x2d   : >>> { %v516_v8 = vsel %vm320_vm0, %v472_v61, 0.0  ;;  %936 = vmatprep.mubr.msk.f32.mxu1 %vm1065_vm1, %v1066_v11 }
  0x2e   : >>> { %893 = vmatmul.mubr.msk.bf16.gmra.mrb[4].mxu0 %vm320_vm0, %v258_v23  ;;  %487 = vadd.xlane.f32.xlu0 %v486_v33  ;;  %v519_v9 = vsel %vm320_vm0, %v473_v63, 0.0 }
  0x2f   : >>> { %896 = vmatprep.mubr.msk.bf16.mxu0 %vm320_vm0, %v260_v26  ;;  %490 = vadd.xlane.f32.xlu1 %v489_v36 }
  0x32   : >>> { %493 = vadd.xlane.f32.xlu0 %v492_v41 }
  0x33   : >>> { %496 = vadd.xlane.f32.xlu1 %v495_v44 }
  0x36   : >>> { %897 = vmatmul.mubr.msk.bf16.gmra.mrb[8].mxu0 %vm320_vm0, %v262_v39  ;;  %499 = vadd.xlane.f32.xlu0 %v498_v47 }
  0x37   : >>> { %900 = vmatprep.mubr.msk.bf16.mxu0 %vm320_vm0, %v264_v40  ;;  %502 = vadd.xlane.f32.xlu1 %v501_v50 }
  0x3a   : >>> { %505 = vadd.xlane.f32.xlu0 %v504_v54 }
  0x3b   : >>> { %508 = vadd.xlane.f32.xlu1 %v507_v57 }
  0x3e   : >>> { %901 = vmatmul.mubr.msk.bf16.gmra.mrb[12].mxu0 %vm320_vm0, %v266_v53  ;;  %511 = vadd.xlane.f32.xlu0 %v510_v60 }
  0x3f   : >>> { %514 = vadd.xlane.f32.xlu1 %v513_v62 }
  0x42   : >>> { %517 = vadd.xlane.f32.xlu0 %v516_v8 }
  0x43   : >>> { %520 = vadd.xlane.f32.xlu1 %v519_v9 }
  0xb3   : >>> { %v476_v12 = vpop.xlane.xlu0 %475 }
  0xb4   : >>> { %v482_v13 = vpop.xlane.xlu1 %481 }
  0xb7   : >>> { %v479_v14 = vpop.xlane.xlu0 %478 }
  0xb8   : >>> { %v485_v15 = vpop.xlane.xlu1 %484 }
  0xbb   : >>> { %v488_v16 = vpop.xlane.xlu0 %487 }
  0xbc   : >>> { %v491_v17 = vpop.xlane.xlu1 %490 }
  0xbf   : >>> { %v494_v18 = vpop.xlane.xlu0 %493 }
  0xc0   : >>> { %v497_v20 = vpop.xlane.xlu1 %496 }
  0xc3   : >>> { %v500_v24 = vpop.xlane.xlu0 %499 }
  0xc4   : >>> { %v503_v25 = vpop.xlane.xlu1 %502 }
  0xc7   : >>> { %v506_v33 = vpop.xlane.xlu0 %505 }
  0xc8   : >>> { %v509_v41 = vpop.xlane.xlu1 %508 }
  0xcb   : >>> { %v512_v45 = vpop.xlane.xlu0 %511 }
  0xcc   : >>> { %v515_v50 = vpop.xlane.xlu1 %514 }
  0xcf   : >>> { %v518_v58 = vpop.xlane.xlu0 %517 }
  0xd0   : >>> { %v521_v60 = vpop.xlane.xlu1 %520 }
  0xf9   : >>> { %v890_v19 = vpop.f32.mrb[0].mxu0 }
  0xfa   : >>> { %v379_v21 = vpop.f32.mrb[1].mxu0  ;;  %v1190_v27 = vsub.f32 %v890_v19, %v482_v13 }
  0xfb   : >>> { %v891_v22 = vpop.f32.mrb[2].mxu0  ;;  %v522_v30 = vsub.f32 %v379_v21, %v476_v12 }
  0xfc   : >>> { %v382_v23 = vpop.f32.mrb[3].mxu0  ;;  %v525_v34 = vsub.f32 %v891_v22, %v485_v15 }
  0xfd   : >>> { %v523_v38 = vsub.f32 %v382_v23, %v479_v14 }
 0x101   : >>> { %v894_v26 = vpop.f32.mrb[4].mxu0 }
 0x102   : >>> { %v1192_v28 = vsub.f32 %v894_v26, %v494_v18  ;;  %v395_v29 = vpop.f32.mrb[5].mxu0 }
 0x103   : >>> { %v1194_v31 = vsub.f32 %v395_v29, %v488_v16  ;;  %v895_v32 = vpop.f32.mrb[6].mxu0 }
 0x104   : >>> { %v540_v35 = vmax.f32 %v1190_v27, %v1192_v28  ;;  %v1198_v36 = vsub.f32 %v895_v32, %v497_v20  ;;  %v398_v37 = vpop.f32.mrb[7].mxu0 }
 0x105   : >>> { %v538_v39 = vmax.f32 %v522_v30, %v1194_v31  ;;  %v527_v40 = vsub.f32 %v398_v37, %v491_v17 }
 0x106   : >>> { %v541_v42 = vmax.f32 %v525_v34, %v1198_v36 }
 0x107   : >>> { %v539_v43 = vmax.f32 %v523_v38, %v527_v40 }
 0x109   : >>> { %v898_v44 = vpop.f32.mrb[8].mxu0 }
 0x10a   : >>> { %v1202_v46 = vsub.f32 %v898_v44, %v506_v33  ;;  %v411_v47 = vpop.f32.mrb[9].mxu0 }
 0x10b   : >>> { %v1204_v48 = vsub.f32 %v411_v47, %v500_v24  ;;  %v899_v49 = vpop.f32.mrb[10].mxu0 }
 0x10c   : >>> { %v544_v51 = vmax.f32 %v540_v35, %v1202_v46  ;;  %v1207_v52 = vsub.f32 %v899_v49, %v509_v41  ;;  %v414_v53 = vpop.f32.mrb[11].mxu0 }
 0x10d   : >>> { %v542_v54 = vmax.f32 %v538_v39, %v1204_v48  ;;  %v531_v55 = vsub.f32 %v414_v53, %v503_v25 }
 0x10e   : >>> { %v545_v56 = vmax.f32 %v541_v42, %v1207_v52 }
 0x10f   : >>> { %v543_v57 = vmax.f32 %v539_v43, %v531_v55 }
 0x111   : >>> { %v902_v59 = vpop.f32.mrb[12].mxu0 }
 0x112   : >>> { %v536_v61 = vsub.f32 %v902_v59, %v518_v58  ;;  %v427_v62 = vpop.f32.mrb[13].mxu0 }
 0x113   : >>> { %v534_v63 = vsub.f32 %v427_v62, %v512_v45  ;;  %v903_v8 = vpop.f32.mrb[14].mxu0 }
 0x114   : >>> { %v548_v9 = vmax.f32 %v544_v51, %v536_v61  ;;  %v537_v11 = vsub.f32 %v903_v8, %v521_v60  ;;  %v430_v12 = vpop.f32.mrb[15].mxu0 }
 0x115   : >>> { %v546_v13 = vmax.f32 %v542_v54, %v534_v63  ;;  %v535_v14 = vsub.f32 %v430_v12, %v515_v50 }
 0x116   : >>> { %v549_v15 = vmax.f32 %v545_v56, %v537_v11 }
 0x117   : >>> { %v547_v16 = vmax.f32 %v543_v57, %v535_v14 }
 0x118   : >>> { %v551_v17 = vmax.f32 %v548_v9, %v549_v15 }
 0x119   : >>> { %v550_v18 = vmax.f32 %v546_v13, %v547_v16 }
 0x11b   : >>> { %v552_v19 = vmax.f32 %v550_v18, %v551_v17 }
 0x11d   : >>> { %v553_v20 = vrot.slane %v552_v19, 4 }
 0x11f   : >>> { %v554_v21 = vmax.f32 %v552_v19, %v553_v20 }
 0x121   : >>> { %v555_v22 = vrot.slane %v554_v21, 2 }
 0x123   : >>> { %v556_v23 = vmax.f32 %v554_v21, %v555_v22 }
 0x125   : >>> { %v557_v24 = vrot.slane %v556_v23, 1 }
 0x127   : >>> { %v558_v25 = vmax.f32 %v556_v23, %v557_v24 }
 0x129   : >>> { %v572_v26 = vsub.f32 %v535_v14, %v558_v25  ;;  %v559_v29 = vsub.f32 %v522_v30, %v558_v25  ;;  %v560_v32 = vsub.f32 %v523_v38, %v558_v25  ;;  %v561_v33 = vsub.f32 %v1190_v27, %v558_v25 }
 0x12a   : >>> { %v562_v35 = vsub.f32 %v525_v34, %v558_v25  ;;  %v563_v37 = vsub.f32 %v1194_v31, %v558_v25  ;;  %v564_v39 = vsub.f32 %v527_v40, %v558_v25  ;;  %v565_v41 = vsub.f32 %v1192_v28, %v558_v25 }
 0x12b   : >>> { %v601_v42 = vmul.f32 1.442695, %v572_v26  ;;  %v575_v43 = vmul.f32 1.442695, %v559_v29  ;;  %v577_v44 = vmul.f32 1.442695, %v560_v32  ;;  %v566_v45 = vsub.f32 %v1198_v36, %v558_v25 }
 0x12c   : >>> { %v579_v47 = vmul.f32 1.442695, %v561_v33  ;;  %v567_v49 = vsub.f32 %v1204_v48, %v558_v25  ;;  %v581_v50 = vmul.f32 1.442695, %v562_v35  ;;  %v583_v30 = vmul.f32 1.442695, %v563_v37 }
 0x12d   : >>> { %1006 = vpow2.f32 %v601_v42  ;;  %v585_v38 = vmul.f32 1.442695, %v564_v39  ;;  %v568_v27 = vsub.f32 %v531_v55, %v558_v25  ;;  %v569_v34 = vsub.f32 %v1202_v46, %v558_v25 }
 0x12e   : >>> { %1008 = vpow2.f32 %v575_v43  ;;  %v570_v31 = vsub.f32 %v1207_v52, %v558_v25  ;;  %v571_v28 = vsub.f32 %v534_v63, %v558_v25  ;;  %v573_v40 = vsub.f32 %v536_v61, %v558_v25 }
 0x12f   : >>> { %1010 = vpow2.f32 %v577_v44  ;;  %v587_v51 = vmul.f32 1.442695, %v565_v41  ;;  %v574_v53 = vsub.f32 %v537_v11, %v558_v25  ;;  %v589_v36 = vmul.f32 1.442695, %v566_v45 }
 0x130   : >>> { %1012 = vpow2.f32 %v579_v47  ;;  %v591_v48 = vmul.f32 1.442695, %v567_v49  ;;  %v593_v54 = vmul.f32 1.442695, %v568_v27  ;;  %v595_v56 = vmul.f32 1.442695, %v569_v34 }
 0x131   : >>> { %1014 = vpow2.f32 %v581_v50  ;;  %v597_v55 = vmul.f32 1.442695, %v570_v31  ;;  %v599_v46 = vmul.f32 1.442695, %v571_v28  ;;  %v603_v52 = vmul.f32 1.442695, %v573_v40 }
 0x132   : >>> { %1016 = vpow2.f32 %v583_v30  ;;  %v605_v59 = vmul.f32 1.442695, %v574_v53 }
 0x133   : >>> { %1018 = vpow2.f32 %v585_v38  ;;  %v630_v38 = vld [vmem:[%s629_s15] sm:$0x7] }
 0x134   : >>> { %1020 = vpow2.f32 %v587_v51 }
 0x135   : >>> { %1022 = vpow2.f32 %v589_v36 }
 0x136   : >>> { %1024 = vpow2.f32 %v591_v48 }
 0x137   : >>> { %v1007_v57 = vpop.eup %1006  ;;  %1026 = vpow2.f32 %v593_v54 }
 0x138   : >>> { %v1009_v58 = vpop.eup %1008  ;;  %1028 = vpow2.f32 %v595_v56 }
 0x139   : >>> { %v1011_v60 = vpop.eup %1010  ;;  %1030 = vpow2.f32 %v597_v55 }
 0x13a   : >>> { %v1013_v61 = vpop.eup %1012  ;;  %v607_v62 = vadd.f32 %v1011_v60, %v1009_v58  ;;  %v940_v63 = vpack.c.bf16 %v1011_v60, %v1009_v58  ;;  %1032 = vpow2.f32 %v599_v46 }
 0x13b   : >>> { %v1015_v8 = vpop.eup %1014  ;;  %1034 = vpow2.f32 %v603_v52 }
 0x13c   : >>> { %v1017_v9 = vpop.eup %1016  ;;  %941 = vmatpush3.bf16.msra.mxu1 %v940_v63  ;;  %v608_v11 = vadd.f32 %v1013_v61, %v607_v62  ;;  %v943_v12 = vpack.c.bf16 %v1015_v8, %v1013_v61  ;;  %1036 = vpow2.f32 %v605_v59 }
 0x13d   : >>> { %v1019_v13 = vpop.eup %1018  ;;  %942 = vmatprep.subr.bf16.mxu1 %v1064_v10 }
 0x13e   : >>> { %v1021_v14 = vpop.eup %1020  ;;  %v609_v15 = vadd.f32 %v1015_v8, %v608_v11  ;;  %v946_v16 = vpack.c.bf16 %v1019_v13, %v1017_v9 }
 0x13f   : >>> { %v1023_v17 = vpop.eup %1022 }
 0x140   : >>> { %v1025_v18 = vpop.eup %1024  ;;  %944 = vmatpush3.bf16.msra.mxu1 %v943_v12  ;;  %v610_v19 = vadd.f32 %v1017_v9, %v609_v15  ;;  %v949_v20 = vpack.c.bf16 %v1023_v17, %v1021_v14 }
 0x141   : >>> { %v1027_v21 = vpop.eup %1026  ;;  %945 = vmatprep.subr.bf16.mxu1 %v1064_v10 }
 0x142   : >>> { %v1029_v22 = vpop.eup %1028  ;;  %v611_v23 = vadd.f32 %v1019_v13, %v610_v19  ;;  %v952_v24 = vpack.c.bf16 %v1027_v21, %v1025_v18 }
 0x143   : >>> { %v1031_v25 = vpop.eup %1030 }
 0x144   : >>> { %v1033_v26 = vpop.eup %1032  ;;  %947 = vmatpush3.bf16.msra.mxu1 %v946_v16  ;;  %v612_v29 = vadd.f32 %v1021_v14, %v611_v23  ;;  %v955_v32 = vpack.c.bf16 %v1031_v25, %v1029_v22 }
 0x145   : >>> { %v1035_v33 = vpop.eup %1034  ;;  %948 = vmatprep.subr.bf16.mxu1 %v1064_v10  ;;  %v958_v35 = vpack.c.bf16 %v1007_v57, %v1033_v26 }
 0x146   : >>> { %v1037_v37 = vpop.eup %1036  ;;  %v613_v39 = vadd.f32 %v1023_v17, %v612_v29 }
 0x147   : >>> { %v961_v41 = vpack.c.bf16 %v1037_v37, %v1035_v33 }
 0x148   : >>> { %950 = vmatpush3.bf16.msra.mxu1 %v949_v20  ;;  %v614_v42 = vadd.f32 %v1025_v18, %v613_v39 }
 0x149   : >>> { %951 = vmatprep.subr.bf16.mxu1 %v1064_v10 }
 0x14a   : >>> { %v615_v43 = vadd.f32 %v1027_v21, %v614_v42 }
 0x14c   : >>> { %953 = vmatpush3.bf16.msra.mxu1 %v952_v24  ;;  %v616_v44 = vadd.f32 %v1029_v22, %v615_v43 }
 0x14d   : >>> { %954 = vmatprep.subr.bf16.mxu1 %v1064_v10 }
 0x14e   : >>> { %v617_v45 = vadd.f32 %v1031_v25, %v616_v44 }
 0x150   : >>> { %956 = vmatpush3.bf16.msra.mxu1 %v955_v32  ;;  %v618_v47 = vadd.f32 %v1033_v26, %v617_v45 }
 0x151   : >>> { %957 = vmatprep.subr.bf16.mxu1 %v1064_v10 }
 0x152   : >>> { %v619_v49 = vadd.f32 %v1007_v57, %v618_v47 }
 0x154   : >>> { %959 = vmatpush3.bf16.msra.mxu1 %v958_v35  ;;  %v620_v50 = vadd.f32 %v1035_v33, %v619_v49 }
 0x155   : >>> { %960 = vmatprep.subr.bf16.mxu1 %v1064_v10 }
 0x156   : >>> { %v621_v30 = vadd.f32 %v1037_v37, %v620_v50 }
 0x158   : >>> { %962 = vmatpush3.bf16.msra.mxu1 %v961_v41  ;;  %v622_v27 = vrot.slane %v621_v30, 4 }
 0x15a   : >>> { %v623_v34 = vadd.f32 %v622_v27, %v621_v30 }
 0x15b   : >>> { %937 = vmatmul.mubr.f32.vlgmr.msra.gmra.mrb[0].mxu1 %v630_v38 }
 0x15c   : >>> { %v624_v31 = vrot.slane %v623_v34, 2 }
 0x15e   : >>> { %v625_v28 = vadd.f32 %v624_v31, %v623_v34 }
 0x160   : >>> { %v626_v40 = vrot.slane %v625_v28, 1 }
 0x162   : >>> { %v627_v51 = vadd.f32 %v626_v40, %v625_v28 }
 0x164   : >>> { %1038 = vrcp.f32 %v627_v51 }
 0x16e   : >>> { %v1039_v53 = vpop.eup %1038 }
 0x22b   : >> { %245 = sbr.rel (!%p243_p7) target bundleno = 28 (0x1c), region = 86 }
 0x22e   : >>> { %v697_v36 = vpop.f32.mrb[0].mxu1 }
 0x22f   : >>> { %v702_v48 = vmul.f32 %v1039_v53, %v697_v36  ;;  %v938_v54 = vpop.f32.mrb[1].mxu1 }
 0x231   : >>> { %704 = vst [vmem:[%s703_s16] sm:$0x7] %v702_v48 }
 0x232   : > { %229 = sbr.rel (!%p226_p8) target bundleno = 23 (0x17), region = 97 }
 0x239 PF: > { %s13_s12 = sadd.s32 1, %s1054_s12  }
 0x23a   : > { %p10_p9 = scmp.ge.s32.totalorder %s13_s12, 4  }
 0x23c   :  { %12 = sbr.rel (!%p10_p9) target bundleno = 1 (0x1), region = 108 }

</bundles_post_ra>
